<compile_context>
chip_gen: v7x
topology: tpu7x:2x2x1
jax: 0.10.0
libtpu: 0.0.40
codegen_flags: <defaults>
</compile_context>

<pallas_src>
import jax
import jax.numpy as jnp
from jax.experimental import pallas as pl
from jax.experimental.pallas import tpu as pltpu


def _round_up(a, b):
    return (a + b - 1) // b * b


def _cdiv(a, b):
    return -(-a // b)


# ---------------------------------------------------------------------------
# Kernel 1: batched z-MLPs -> (1 + gamma), beta.
#   gamma/beta first layers fused into one matmul + one SiLU.
# ---------------------------------------------------------------------------
def film_mlp_kernel(z_ref, w1_ref, b1_ref, w2g_ref, b2g_ref, w2b_ref, b2b_ref,
                    g1_ref, bt_ref):
    z = z_ref[...]                                                   # (TB, D2)
    h = jnp.dot(z, w1_ref[...], preferred_element_type=jnp.float32) + b1_ref[...]
    h = h * jax.nn.sigmoid(h)                                        # SiLU, (TB, 2H)

    hidden = w2g_ref.shape[0]
    gamma = jnp.dot(h[:, :hidden], w2g_ref[...],
                    preferred_element_type=jnp.float32) + b2g_ref[...]
    beta = jnp.dot(h[:, hidden:], w2b_ref[...],
                   preferred_element_type=jnp.float32) + b2b_ref[...]

    g1_ref[...] = (1.0 + gamma).astype(g1_ref.dtype)                 # (TB, D1)
    bt_ref[...] = beta.astype(bt_ref.dtype)                          # (TB, D1)


# ---------------------------------------------------------------------------
# Kernel 2: streaming FiLM modulation  out = g1 * x + beta  (HBM-bound)
# ---------------------------------------------------------------------------
def film_mod_kernel(g1_ref, bt_ref, x_ref, o_ref):
    # g1_ref/bt_ref: (1, TF); x_ref/o_ref: (TS, TF). Broadcast over rows.
    o_ref[...] = (x_ref[...] * g1_ref[...] + bt_ref[...]).astype(o_ref.dtype)


def _vmem_budget():
    """Generation-gated (target block bytes, vmem_limit_bytes)."""
    try:
        vmem_cap = pltpu.get_tpu_info().vmem_capacity_bytes
    except Exception:
        vmem_cap = 64 << 20
    if vmem_cap >= (100 << 20):          # v5e / v6e: 128 MiB physical VMEM
        return 4 << 20, 64 << 20
    return 3 << 20, 32 << 20             # v7x: 64 MiB physical VMEM


def film(x, z, params):
    """x: (B, S, D1), z: (B, 1, D2)."""
    B, S, D1 = x.shape
    _, _, D2 = z.shape
    hidden = params["w1g"].shape[1]

    # ---- Stage 1: z-MLPs once for all B rows -------------------------------
    w1 = jnp.concatenate([params["w1g"], params["w1b"]], axis=1)     # (D2, 2H)
    b1 = jnp.concatenate([params["b1g"], params["b1b"]], axis=1)     # (1, 2H)
    z2 = z[:, 0, :]                                                  # (B, D2)

    TB = B if B <= 512 else 512
    nb = _cdiv(B, TB)
    g1, beta = pl.pallas_call(
        film_mlp_kernel,
        out_shape=(jax.ShapeDtypeStruct((B, D1), jnp.float32),
                   jax.ShapeDtypeStruct((B, D1), jnp.float32)),
        grid_spec=pltpu.PrefetchScalarGridSpec(
            num_scalar_prefetch=0,
            grid=(nb,),
            in_specs=[
                pl.BlockSpec((TB, D2), lambda i: (i, 0)),            # z
                pl.BlockSpec((D2, 2 * hidden), lambda i: (0, 0)),    # W1 (fused)
                pl.BlockSpec((1, 2 * hidden), lambda i: (0, 0)),     # b1 (fused)
                pl.BlockSpec((hidden, D1), lambda i: (0, 0)),        # W2 gamma
                pl.BlockSpec((1, D1), lambda i: (0, 0)),             # b2 gamma
                pl.BlockSpec((hidden, D1), lambda i: (0, 0)),        # W2 beta
                pl.BlockSpec((1, D1), lambda i: (0, 0)),             # b2 beta
            ],
            out_specs=(pl.BlockSpec((TB, D1), lambda i: (i, 0)),
                       pl.BlockSpec((TB, D1), lambda i: (i, 0))),
        ),
        compiler_params=pltpu.CompilerParams(
            dimension_semantics=("parallel",)),
    )(z2, w1, b1, params["w2g"], params["b2g"], params["w2b"], params["b2b"])

    # ---- Stage 2: streaming modulation (no wrapper pad / slice) -------------
    itemsize = jnp.dtype(x.dtype).itemsize
    sub = max(8, 32 // itemsize)              # f32: 8, bf16: 16, int8/fp8: 32

    reshape_back = False
    if D1 % 128 == 0:
        # Already lane-dense.
        F, Sv, x_view = D1, S, x
        g1_v, bt_v = g1[:, None, :], beta[:, None, :]
    elif 128 % D1 == 0 and (S * D1) % 128 == 0:
        # Free contiguous view of x; lane-tile g1/beta (tiny: only B rows).
        reps = 128 // D1
        F, Sv = 128, (S * D1) // 128
        x_view = x.reshape(B, Sv, F)
        g1_v = jnp.tile(g1, (1, reps))[:, None, :]
        bt_v = jnp.tile(beta, (1, reps))[:, None, :]
        reshape_back = True
    else:
        # Full-D1 feature block (always legal). Masked stores can't become the
        # bottleneck of this HBM-bound kernel.
        F, Sv, x_view = D1, S, x
        g1_v, bt_v = g1[:, None, :], beta[:, None, :]

    block_bytes, vmem_limit = _vmem_budget()
    # Double-buffered x + out blocks (4 live copies) must fit under the limit.
    block_bytes = min(block_bytes, (vmem_limit - (2 << 20)) // 4)

    # Feature tile: only split when lane-dense and extremely wide.
    if F % 128 == 0:
        max_tf = max(128, (block_bytes // (sub * itemsize)) // 128 * 128)
        TF = min(F, max_tf)
    else:
        TF = F
    nf = _cdiv(F, TF)

    # Row (S) tile: dtype-aware sublane multiple, sized to the block budget.
    rows = max(sub, (block_bytes // (TF * itemsize)) // sub * sub)
    TS = rows if rows < Sv else Sv
    ns = _cdiv(Sv, TS)

    # v7x: nudge the grid so the parallel steps split evenly across 2 TCs.
    if (B * ns * nf) % 2 == 1 and Sv >= 2 * sub:
        cand = min(_round_up(_cdiv(Sv, ns + 1), sub), Sv)
        if (B * _cdiv(Sv, cand) * nf) % 2 == 0:
            TS, ns = cand, _cdiv(Sv, cand)

    out = pl.pallas_call(
        film_mod_kernel,
        out_shape=jax.ShapeDtypeStruct((B, Sv, F), x.dtype),
        grid_spec=pltpu.PrefetchScalarGridSpec(
            num_scalar_prefetch=0,
            grid=(B, ns, nf),
            in_specs=[
                pl.BlockSpec((None, 1, TF), lambda b, s, f: (b, 0, f)),   # g1
                pl.BlockSpec((None, 1, TF), lambda b, s, f: (b, 0, f)),   # beta
                pl.BlockSpec((None, TS, TF), lambda b, s, f: (b, s, f)),  # x
            ],
            out_specs=pl.BlockSpec((None, TS, TF), lambda b, s, f: (b, s, f)),
        ),
        compiler_params=pltpu.CompilerParams(
            dimension_semantics=("parallel", "parallel", "parallel"),
            vmem_limit_bytes=vmem_limit,
        ),
    )(g1_v, bt_v, x_view)

    if reshape_back:
        out = out.reshape(B, S, D1)      # contiguous view back to (B, S, D1)
    return out


def film_reference(x, z, p):
    def mlp(zz, w1, b1, w2, b2):
        h = zz @ w1 + b1
        h = h * jax.nn.sigmoid(h)
        return h @ w2 + b2
    gamma = mlp(z, p["w1g"], p["b1g"], p["w2g"], p["b2g"])
    beta = mlp(z, p["w1b"], p["b1b"], p["w2b"], p["b2b"])
    return (1.0 + gamma) * x + beta


def _make_params(key, D2, H, D1, scale=0.1):
    ks = jax.random.split(key, 8)
    return {
        "w1g": scale * jax.random.normal(ks[0], (D2, H), dtype=jnp.float32),
        "b1g": scale * jax.random.normal(ks[1], (1, H), dtype=jnp.float32),
        "w2g": scale * jax.random.normal(ks[2], (H, D1), dtype=jnp.float32),
        "b2g": scale * jax.random.normal(ks[3], (1, D1), dtype=jnp.float32),
        "w1b": scale * jax.random.normal(ks[4], (D2, H), dtype=jnp.float32),
        "b1b": scale * jax.random.normal(ks[5], (1, H), dtype=jnp.float32),
        "w2b": scale * jax.random.normal(ks[6], (H, D1), dtype=jnp.float32),
        "b2b": scale * jax.random.normal(ks[7], (1, D1), dtype=jnp.float32),
    }


if __name__ == "__main__":
    film_jit = jax.jit(film)

    # Case 1: small D1 with 128 % D1 == 0 -> free lane-dense reshape path.
    B, S, D1, D2, H = 2, 8, 32, 16, 32
    key = jax.random.PRNGKey(0)
    kx, kz, kp = jax.random.split(key, 3)
    x = jax.random.normal(kx, (B, S, D1), dtype=jnp.float32)
    z = jax.random.normal(kz, (B, 1, D2), dtype=jnp.float32)
    params = _make_params(kp, D2, H, D1)

    out = jax.block_until_ready(film_jit(x, z, params))
    ref = film_reference(x, z, params)
    assert out.shape == (B, S, D1)
    assert jnp.allclose(out, ref, atol=1e-5, rtol=1e-5), "mismatch (reshape path)"

    # Case 2: lane-dense feature dim (D1 % 128 == 0) -> direct streaming path.
    B2, S2, D1b = 2, 16, 128
    kx2, kz2, kp2 = jax.random.split(jax.random.PRNGKey(1), 3)
    x2 = jax.random.normal(kx2, (B2, S2, D1b), dtype=jnp.float32)
    z2 = jax.random.normal(kz2, (B2, 1, D2), dtype=jnp.float32)
    params2 = _make_params(kp2, D2, H, D1b)

    out2 = jax.block_until_ready(film_jit(x2, z2, params2))
    ref2 = film_reference(x2, z2, params2)
    assert out2.shape == (B2, S2, D1b)
    assert jnp.allclose(out2, ref2, atol=1e-5, rtol=1e-5), "mismatch (dense path)"

    # Case 3: D1 that divides neither way (48) -> full-D1 fallback path.
    B3, S3, D1c = 2, 8, 48
    kx3, kz3, kp3 = jax.random.split(jax.random.PRNGKey(2), 3)
    x3 = jax.random.normal(kx3, (B3, S3, D1c), dtype=jnp.float32)
    z3 = jax.random.normal(kz3, (B3, 1, D2), dtype=jnp.float32)
    params3 = _make_params(kp3, D2, H, D1c)

    out3 = jax.block_until_ready(film_jit(x3, z3, params3))
    ref3 = film_reference(x3, z3, params3)
    assert out3.shape == (B3, S3, D1c)
    assert jnp.allclose(out3, ref3, atol=1e-5, rtol=1e-5), "mismatch (fallback path)"

    print("KERNEL_OK")
</pallas_src>

<mosaic_0001>
module attributes {stable_mosaic.version = 11 : i64} {
  func.func @film_mlp_kernel(%arg0: i32, %arg1: memref<2x16xf32, #tpu.memory_space<vmem>>, %arg2: memref<16x64xf32, #tpu.memory_space<vmem>>, %arg3: memref<1x64xf32, #tpu.memory_space<vmem>>, %arg4: memref<32x32xf32, #tpu.memory_space<vmem>>, %arg5: memref<1x32xf32, #tpu.memory_space<vmem>>, %arg6: memref<32x32xf32, #tpu.memory_space<vmem>>, %arg7: memref<1x32xf32, #tpu.memory_space<vmem>>, %arg8: memref<2x32xf32, #tpu.memory_space<vmem>>, %arg9: memref<2x32xf32, #tpu.memory_space<vmem>>) attributes {dimension_semantics = [#tpu.dimension_semantics<parallel>], iteration_bounds = array<i64: 1>, scalar_prefetch = 0 : i64, scratch_operands = 0 : i64, tpu.core_type = #tpu.core_type<tc>, window_params = [{transform_indices = @transform_0, window_bounds = array<i64: 2, 16>}, {pipeline_mode = #tpu.pipeline_mode<synchronous>, transform_indices = @transform_1, window_bounds = array<i64: 16, 64>}, {pipeline_mode = #tpu.pipeline_mode<synchronous>, transform_indices = @transform_2, window_bounds = array<i64: 1, 64>}, {pipeline_mode = #tpu.pipeline_mode<synchronous>, transform_indices = @transform_3, window_bounds = array<i64: 32, 32>}, {pipeline_mode = #tpu.pipeline_mode<synchronous>, transform_indices = @transform_4, window_bounds = array<i64: 1, 32>}, {pipeline_mode = #tpu.pipeline_mode<synchronous>, transform_indices = @transform_5, window_bounds = array<i64: 32, 32>}, {pipeline_mode = #tpu.pipeline_mode<synchronous>, transform_indices = @transform_6, window_bounds = array<i64: 1, 32>}, {transform_indices = @transform_7, window_bounds = array<i64: 2, 32>}, {transform_indices = @transform_8, window_bounds = array<i64: 2, 32>}]} {
    %c0 = arith.constant 0 : index
    %c0_0 = arith.constant 0 : index
    %0 = vector.load %arg1[%c0, %c0_0] : memref<2x16xf32, #tpu.memory_space<vmem>>, vector<2x16xf32>
    %c0_1 = arith.constant 0 : index
    %c0_2 = arith.constant 0 : index
    %1 = vector.load %arg2[%c0_1, %c0_2] : memref<16x64xf32, #tpu.memory_space<vmem>>, vector<16x64xf32>
    %cst = arith.constant dense<0.000000e+00> : vector<2x64xf32>
    %2 = tpu.matmul %0, %1, %cst {dimension_numbers = #tpu.dot_dimension_numbers<[1], [0], [0], [1], [0, 0, 1, 1], [], []>} : vector<2x16xf32>, vector<16x64xf32>, vector<2x64xf32> -> vector<2x64xf32>
    %c0_3 = arith.constant 0 : index
    %c0_4 = arith.constant 0 : index
    %3 = vector.load %arg3[%c0_3, %c0_4] : memref<1x64xf32, #tpu.memory_space<vmem>>, vector<1x64xf32>
    %4 = vector.broadcast %3 : vector<1x64xf32> to vector<2x64xf32>
    %5 = arith.addf %2, %4 : vector<2x64xf32>
    %6 = arith.negf %5 : vector<2x64xf32>
    %7 = math.exp %6 : vector<2x64xf32>
    %cst_5 = arith.constant 1.000000e+00 : f32
    %8 = vector.broadcast %cst_5 : f32 to vector<2x64xf32>
    %9 = arith.addf %8, %7 : vector<2x64xf32>
    %10 = arith.divf %8, %9 : vector<2x64xf32>
    %11 = arith.mulf %5, %10 : vector<2x64xf32>
    %12 = vector.extract_strided_slice %11 {offsets = [0, 0], sizes = [2, 32], strides = [1, 1]} : vector<2x64xf32> to vector<2x32xf32>
    %c0_6 = arith.constant 0 : index
    %c0_7 = arith.constant 0 : index
    %13 = vector.load %arg4[%c0_6, %c0_7] : memref<32x32xf32, #tpu.memory_space<vmem>>, vector<32x32xf32>
    %cst_8 = arith.constant dense<0.000000e+00> : vector<2x32xf32>
    %14 = tpu.matmul %12, %13, %cst_8 {dimension_numbers = #tpu.dot_dimension_numbers<[1], [0], [0], [1], [0, 0, 1, 1], [], []>} : vector<2x32xf32>, vector<32x32xf32>, vector<2x32xf32> -> vector<2x32xf32>
    %c0_9 = arith.constant 0 : index
    %c0_10 = arith.constant 0 : index
    %15 = vector.load %arg5[%c0_9, %c0_10] : memref<1x32xf32, #tpu.memory_space<vmem>>, vector<1x32xf32>
    %16 = vector.broadcast %15 : vector<1x32xf32> to vector<2x32xf32>
    %17 = arith.addf %14, %16 : vector<2x32xf32>
    %18 = vector.extract_strided_slice %11 {offsets = [0, 32], sizes = [2, 32], strides = [1, 1]} : vector<2x64xf32> to vector<2x32xf32>
    %c0_11 = arith.constant 0 : index
    %c0_12 = arith.constant 0 : index
    %19 = vector.load %arg6[%c0_11, %c0_12] : memref<32x32xf32, #tpu.memory_space<vmem>>, vector<32x32xf32>
    %cst_13 = arith.constant dense<0.000000e+00> : vector<2x32xf32>
    %20 = tpu.matmul %18, %19, %cst_13 {dimension_numbers = #tpu.dot_dimension_numbers<[1], [0], [0], [1], [0, 0, 1, 1], [], []>} : vector<2x32xf32>, vector<32x32xf32>, vector<2x32xf32> -> vector<2x32xf32>
    %c0_14 = arith.constant 0 : index
    %c0_15 = arith.constant 0 : index
    %21 = vector.load %arg7[%c0_14, %c0_15] : memref<1x32xf32, #tpu.memory_space<vmem>>, vector<1x32xf32>
    %22 = vector.broadcast %21 : vector<1x32xf32> to vector<2x32xf32>
    %23 = arith.addf %20, %22 : vector<2x32xf32>
    %cst_16 = arith.constant 1.000000e+00 : f32
    %24 = vector.broadcast %cst_16 : f32 to vector<2x32xf32>
    %25 = arith.addf %24, %17 : vector<2x32xf32>
    %c0_17 = arith.constant 0 : index
    %c0_18 = arith.constant 0 : index
    %26 = vector.load %arg8[%c0_17, %c0_18] : memref<2x32xf32, #tpu.memory_space<vmem>>, vector<2x32xf32>
    tpu.vector_store %arg8[%c0_17, %c0_18], %25 {strides = array<i32>} : memref<2x32xf32, #tpu.memory_space<vmem>>, vector<2x32xf32>,
    %c0_19 = arith.constant 0 : index
    %c0_20 = arith.constant 0 : index
    %27 = vector.load %arg9[%c0_19, %c0_20] : memref<2x32xf32, #tpu.memory_space<vmem>>, vector<2x32xf32>
    tpu.vector_store %arg9[%c0_19, %c0_20], %23 {strides = array<i32>} : memref<2x32xf32, #tpu.memory_space<vmem>>, vector<2x32xf32>,
    return
  }
  func.func @transform_0(%arg0: i32) -> (i32, i32) {
    %c0_i32 = arith.constant 0 : i32
    %c0_i32_0 = arith.constant 0 : i32
    return %arg0, %c0_i32 : i32, i32
  }
  func.func @transform_1(%arg0: i32) -> (i32, i32) {
    %c0_i32 = arith.constant 0 : i32
    %c0_i32_0 = arith.constant 0 : i32
    %c0_i32_1 = arith.constant 0 : i32
    return %c0_i32, %c0_i32_0 : i32, i32
  }
  func.func @transform_2(%arg0: i32) -> (i32, i32) {
    %c0_i32 = arith.constant 0 : i32
    %c0_i32_0 = arith.constant 0 : i32
    %c0_i32_1 = arith.constant 0 : i32
    return %c0_i32, %c0_i32_0 : i32, i32
  }
  func.func @transform_3(%arg0: i32) -> (i32, i32) {
    %c0_i32 = arith.constant 0 : i32
    %c0_i32_0 = arith.constant 0 : i32
    %c0_i32_1 = arith.constant 0 : i32
    return %c0_i32, %c0_i32_0 : i32, i32
  }
  func.func @transform_4(%arg0: i32) -> (i32, i32) {
    %c0_i32 = arith.constant 0 : i32
    %c0_i32_0 = arith.constant 0 : i32
    %c0_i32_1 = arith.constant 0 : i32
    return %c0_i32, %c0_i32_0 : i32, i32
  }
  func.func @transform_5(%arg0: i32) -> (i32, i32) {
    %c0_i32 = arith.constant 0 : i32
    %c0_i32_0 = arith.constant 0 : i32
    %c0_i32_1 = arith.constant 0 : i32
    return %c0_i32, %c0_i32_0 : i32, i32
  }
  func.func @transform_6(%arg0: i32) -> (i32, i32) {
    %c0_i32 = arith.constant 0 : i32
    %c0_i32_0 = arith.constant 0 : i32
    %c0_i32_1 = arith.constant 0 : i32
    return %c0_i32, %c0_i32_0 : i32, i32
  }
  func.func @transform_7(%arg0: i32) -> (i32, i32) {
    %c0_i32 = arith.constant 0 : i32
    %c0_i32_0 = arith.constant 0 : i32
    return %arg0, %c0_i32 : i32, i32
  }
  func.func @transform_8(%arg0: i32) -> (i32, i32) {
    %c0_i32 = arith.constant 0 : i32
    %c0_i32_0 = arith.constant 0 : i32
    return %arg0, %c0_i32 : i32, i32
  }
}

module attributes {stable_mosaic.version = 11 : i64} {
  func.func @film_mod_kernel(%arg0: i32, %arg1: i32, %arg2: i32, %arg3: memref<1x1x128xf32, #tpu.memory_space<vmem>>, %arg4: memref<1x1x128xf32, #tpu.memory_space<vmem>>, %arg5: memref<1x2x128xf32, #tpu.memory_space<vmem>>, %arg6: memref<1x2x128xf32, #tpu.memory_space<vmem>>) attributes {dimension_semantics = [#tpu.dimension_semantics<parallel>, #tpu.dimension_semantics<parallel>, #tpu.dimension_semantics<parallel>], iteration_bounds = array<i64: 2, 1, 1>, scalar_prefetch = 0 : i64, scratch_operands = 0 : i64, tpu.core_type = #tpu.core_type<tc>, window_params = [{transform_indices = @transform_0, window_bounds = array<i64: 1, 1, 128>}, {transform_indices = @transform_1, window_bounds = array<i64: 1, 1, 128>}, {transform_indices = @transform_2, window_bounds = array<i64: 1, 2, 128>}, {transform_indices = @transform_3, window_bounds = array<i64: 1, 2, 128>}]} {
    %c0 = arith.constant 0 : index
    %c0_0 = arith.constant 0 : index
    %c0_1 = arith.constant 0 : index
    %0 = vector.load %arg5[%c0, %c0_0, %c0_1] : memref<1x2x128xf32, #tpu.memory_space<vmem>>, vector<1x2x128xf32>
    %1 = vector.shape_cast %0 : vector<1x2x128xf32> to vector<2x128xf32>
    %c0_2 = arith.constant 0 : index
    %c0_3 = arith.constant 0 : index
    %c0_4 = arith.constant 0 : index
    %2 = vector.load %arg3[%c0_2, %c0_3, %c0_4] : memref<1x1x128xf32, #tpu.memory_space<vmem>>, vector<1x1x128xf32>
    %3 = vector.shape_cast %2 : vector<1x1x128xf32> to vector<1x128xf32>
    %4 = vector.broadcast %3 : vector<1x128xf32> to vector<2x128xf32>
    %5 = arith.mulf %1, %4 : vector<2x128xf32>
    %c0_5 = arith.constant 0 : index
    %c0_6 = arith.constant 0 : index
    %c0_7 = arith.constant 0 : index
    %6 = vector.load %arg4[%c0_5, %c0_6, %c0_7] : memref<1x1x128xf32, #tpu.memory_space<vmem>>, vector<1x1x128xf32>
    %7 = vector.shape_cast %6 : vector<1x1x128xf32> to vector<1x128xf32>
    %8 = vector.broadcast %7 : vector<1x128xf32> to vector<2x128xf32>
    %9 = arith.addf %5, %8 : vector<2x128xf32>
    %c0_8 = arith.constant 0 : index
    %c0_9 = arith.constant 0 : index
    %c0_10 = arith.constant 0 : index
    %10 = vector.load %arg6[%c0_8, %c0_9, %c0_10] : memref<1x2x128xf32, #tpu.memory_space<vmem>>, vector<1x2x128xf32>
    %11 = vector.shape_cast %10 : vector<1x2x128xf32> to vector<2x128xf32>
    %12 = vector.shape_cast %9 : vector<2x128xf32> to vector<1x2x128xf32>
    tpu.vector_store %arg6[%c0_8, %c0_9, %c0_10], %12 {strides = array<i32>} : memref<1x2x128xf32, #tpu.memory_space<vmem>>, vector<1x2x128xf32>,
    return
  }
  func.func @transform_0(%arg0: i32, %arg1: i32, %arg2: i32) -> (i32, i32, i32) {
    %c0_i32 = arith.constant 0 : i32
    %c0_i32_0 = arith.constant 0 : i32
    return %arg0, %c0_i32, %arg2 : i32, i32, i32
  }
  func.func @transform_1(%arg0: i32, %arg1: i32, %arg2: i32) -> (i32, i32, i32) {
    %c0_i32 = arith.constant 0 : i32
    %c0_i32_0 = arith.constant 0 : i32
    return %arg0, %c0_i32, %arg2 : i32, i32, i32
  }
  func.func @transform_2(%arg0: i32, %arg1: i32, %arg2: i32) -> (i32, i32, i32) {
    %c0_i32 = arith.constant 0 : i32
    return %arg0, %arg1, %arg2 : i32, i32, i32
  }
  func.func @transform_3(%arg0: i32, %arg1: i32, %arg2: i32) -> (i32, i32, i32) {
    %c0_i32 = arith.constant 0 : i32
    return %arg0, %arg1, %arg2 : i32, i32, i32
  }
}

</mosaic_0001>

<bundles_post_ra>
// kernel: film.3
= control target key start
LH: loop header
LB: loop body
LE: loop exit
PB: predicated region body
PF: predicated region fallthrough
CT: control target
= control target key end

     0   :  { %s484_s12 = smov 0   ;;  %s486_s13 = smov 0   ;;  %s511_s0 = inlined_call_operand.vmem [shape: f32[2,1,128], index: 0, kind: input, shape index: {}]   ;;  %s512_s1 = inlined_call_operand.vmem [shape: f32[2,1,128], index: 1, kind: input, shape index: {}]   ;;  %s513_s2 = inlined_call_operand.vmem [shape: f32[2,2,128], index: 2, kind: input, shape index: {}]   ;;  %s514_s3 = inlined_call_operand.vmem [shape: f32[2,2,128], index: 3, kind: output, shape index: {}]  }
   0x1   :  { %s488_s14 = smov 0  }
   0x2 LB: > { %s32_s15 = sadd.s32 1, %s458_s13  ;;  %p409_p0 = scmp.ge.s32.totalorder %s462_s14, 1  ;;  %s462_s14 = sphi %s488_s14, %s13_s14   ;;  %s458_s13 = sphi %s486_s13, %s516_s13   ;;  %s454_s12 = sphi %s484_s12, %s515_s12  }
   0x3   : > { %p34_p1 = scmp.ge.s32.totalorder %s32_s15, 2  ;;  %p195_p2 = scmp.lt.s32.totalorder %s462_s14, 3 }
   0x5   : > { %s518_s15 = smov (%p34_p1, %s32_s15), 0  ;;  %p196_p3 = pnand %p409_p0, %p195_p2 }
   0x6   : > { %p241_p4 = scmp.lt.s32.totalorder (!%p196_p3), %s454_s12, 1 }
   0x7   : > { %199 = sbr.rel (%p196_p3) target bundleno = 24 (0x18), region = 32 }
   0xe   : > { %s520_s12 = smov (!%p241_p4, %s454_s12), 1 }
   0xf   : > { %s246_s18 = scalar_lea.vmem %s511_s0, %s520_s12  ;;  %s252_s21 = scalar_lea.vmem %s512_s1, %s520_s12 }
  0x10   : > { %s410_s22 = sshll.u32 %s520_s12, 1  ;;  %v412_v0 = vld [vmem:[%s246_s18] ss:$0 sm:$0xff] }
  0x11   : > { %s262_s25 = scalar_lea.vmem %s513_s2, %s410_s22  ;;  %v413_v2 = vld [vmem:[%s252_s21] ss:$0 sm:$0xff]  ;;  %s272_s28 = scalar_lea.vmem %s514_s3, %s410_s22 }
  0x12   : > { %v273_v1 = vld [vmem:[%s262_s25] sm:$0x3] }
  0x13   : > { %v281_v3 = vmul.f32 %v412_v0, %v273_v1 }
  0x15   : > { %v289_v4 = vadd.f32 %v413_v2, %v281_v3 }
  0x17   : > { %290 = vst [vmem:[%s272_s28] sm:$0x3] %v289_v4 }
  0x18 PF: > { %s13_s14 = sadd.s32 1, %s462_s14   ;;  %s515_s12 = smov %s458_s13 }
  0x19   : > { %p10_p5 = scmp.ge.s32.totalorder %s13_s14, 4   ;;  %s516_s13 = smov %s518_s15 }
  0x1b   :  { %12 = sbr.rel (!%p10_p5) target bundleno = 2 (0x2), region = 68 }

// kernel: film.2
= control target key start
LH: loop header
LB: loop body
LE: loop exit
PB: predicated region body
PF: predicated region fallthrough
CT: control target
= control target key end

     0   :  { %14 = vsyncpa [#allocation3], 0  ;;  %s415_s27 = smov [#allocation2]   ;;  %s515_s0 = inlined_call_operand.vmem [shape: f32[2,16], index: 0, kind: input, shape index: {}]   ;;  %s516_s1 = inlined_call_operand.vmem [shape: f32[16,64], index: 1, kind: input, shape index: {}]   ;;  %s517_s2 = inlined_call_operand.vmem [shape: f32[1,64], index: 2, kind: input, shape index: {}]   ;;  %s518_s3 = inlined_call_operand.vmem [shape: f32[32,32], index: 3, kind: input, shape index: {}]   ;;  %s519_s4 = inlined_call_operand.vmem [shape: f32[1,32], index: 4, kind: input, shape index: {}]   ;;  %s520_s5 = inlined_call_operand.hbm [shape: f32[32,32], index: 5, kind: input, shape index: {}]   ;;  %s521_s6 = inlined_call_operand.vmem [shape: f32[1,32], index: 6, kind: input, shape index: {}]   ;;  %s522_s7 = inlined_call_operand.vmem [shape: f32[2,32], index: 7, kind: output, shape index: {0}]   ;;  %s523_s8 = inlined_call_operand.vmem [shape: f32[2,32], index: 8, kind: output, shape index: {1}]  }
   0x1   :  { %s30_s28 = sshll.u32 %s415_s27, 4  ;;  %s391_s9 = scalar_lea.hbm %s520_s5, 512  ;;  %s31_s28 = int_to_ptr.vmem [resolvable:$true] %s30_s28 }
   0x2   :  { %p392_p0 = scmp.ne.s32.totalorder %s520_s5, %s391_s9  ;;  %p395_p1 = scmp.lt.u32.totalorder %s391_s9, %s520_s5 }
   0x4   :  { %p397_p2 = pnand %p395_p1, %p392_p0 }
   0x6   :  { %400 = shalt.err (!%p397_p2)
}
   0x7   :  { %s401_s14 = scalar_lea.vmem %s31_s28, 512  ;;  %p406_p4 = scmp.lt.s32.totalorder %s31_s28, %s31_s28 }
   0x8   :  { %p402_p3 = scmp.ne.s32.totalorder %s31_s28, %s401_s14  ;;  %p407_p5 = scmp.lt.s32.totalorder %s401_s14, %s401_s14 }
   0xa   :  { %p408_p6 = por %p407_p5, %p406_p4 }
   0xc   :  { %p409_p7 = pnand %p408_p6, %p402_p3 }
   0xe   :  { %412 = shalt.err (!%p409_p7)
}
   0xf   :  { %s416_s15 = smov 128   ;;  %s417_s16 = smov 8  }
  0x10   :  { %36 = dma.hbm_to_vmem [thread:$0]  %s520_s5, 512, %s31_s28, [#allocation3], %s416_s15, %s416_s15, %s417_s16  }
  0x11   :  { %413 = dma.done.wait [#allocation3], 512  }
  0x12   :  { %414 = vsyncadd [#allocation3], 4294966784  ;;  %v418_v0 = vmov 0.0|0.0   ;;  %vm419_vm0 = vmmov 0   ;;  %v420_v1 = vmov 0.0   ;;  %v43_v2 = vld [vmem:[%s516_s1] sm:$0xff] }
  0x13   :  { %365 = vmatprep.subr.bf16.mxu0 %v418_v0  ;;  %340 = vmatprep.mubr.msk.f32.mxu0 %vm419_vm0, %v420_v1  ;;  %v44_v3 = vld [vmem:[%s516_s1 + $0x8] sm:$0xff]  ;;  %v42_v5 = vld [vmem:[%s515_s0] sm:$0x3]  ;;  %vm52_vm1 = vcmask 130048   ;;  %v135_v9 = vld [vmem:[%s518_s3 + $0x10] sm:$0xff]  ;;  %vm144_vm2 = vcmask 261120  }
  0x14   :  { %368 = vmatprep.subr.bf16.mxu1 %v418_v0  ;;  %351 = vmatprep.mubr.msk.f32.mxu1 %vm419_vm0, %v420_v1  ;;  %v366_v4 = vpack.c.bf16 %v44_v3, %v43_v2  ;;  %v133_v6 = vld [vmem:[%s518_s3] sm:$0xff]  ;;  %v134_v7 = vld [vmem:[%s518_s3 + $0x8] sm:$0xff]  ;;  %v136_v10 = vld [vmem:[%s518_s3 + $0x18] sm:$0xff]  ;;  %s421_s3 = smov 96   ;;  %vm304_vm3 = vcmask 254976  }
  0x15   :  { %v369_v8 = vpack.c.bf16 %v134_v7, %v133_v6  ;;  %v372_v11 = vpack.c.bf16 %v136_v10, %v135_v9  ;;  %v218_v12 = vld [vmem:[#allocation2] sm:$0xff]  ;;  %v219_v13 = vld [vmem:[#allocation2 + $0x8] sm:$0xff]  ;;  %v220_v14 = vld [vmem:[#allocation2 + $0x10] sm:$0xff] }
  0x16   :  { %367 = vmatpush3.bf16.msra.mxu0 %v366_v4  ;;  %v375_v15 = vpack.c.bf16 %v219_v13, %v218_v12  ;;  %v221_v16 = vld [vmem:[#allocation2 + $0x18] sm:$0xff]  ;;  %v316_v18 = vld [vmem:[%s517_s2] ss:$0 sm:$0xff] }
  0x17   :  { %374 = vmatprep.subr.bf16.mxu0 %v418_v0  ;;  %370 = vmatpush3.bf16.msra.mxu1 %v369_v8  ;;  %v378_v17 = vpack.c.bf16 %v221_v16, %v220_v14  ;;  %v319_v28 = vld [vmem:[%s519_s4] ss:$0 sm:$0xff] }
  0x18   :  { %371 = vmatprep.subr.bf16.mxu1 %v418_v0  ;;  %v321_v33 = vld [vmem:[%s521_s6] ss:$0 sm:$0xff] }
  0x19   :  { %341 = vmatmul.mubr.msk.f32.vlgmr.msra.gmra.mrb[0].mxu0 %vm52_vm1, %v42_v5 }
  0x1a   :  { %362 = vmatprep.mubr.msk.f32.mxu0 %vm419_vm0, %v420_v1  ;;  %376 = vmatpush3.bf16.msra.mxu0 %v375_v15 }
  0x1b   :  { %373 = vmatpush3.bf16.msra.mxu1 %v372_v11  ;;  %377 = vmatprep.subr.bf16.mxu0 %v418_v0 }
  0x1e   :  { %379 = vmatpush3.bf16.msra.mxu0 %v378_v17 }
  0xec   :  { %v122_v19 = vpop.f32.mrb[0].mxu0 }
  0xed   :  { %v123_v20 = vadd.f32 %v316_v18, %v122_v19  ;;  %v342_v21 = vpop.f32.mrb[1].mxu0 }
  0xef   :  { %v318_v22 = vmul.f32 -1.442695, %v123_v20 }
  0xf1   :  { %387 = vpow2.f32 %v318_v22 }
  0xfb   :  { %v388_v23 = vpop.eup %387 }
  0xfc   :  { %v129_v24 = vadd.f32 1.0, %v388_v23 }
  0xfe   :  { %389 = vrcp.f32 %v129_v24 }
 0x108   :  { %v390_v25 = vpop.eup %389 }
 0x109   :  { %v132_v26 = vmul.f32 %v390_v25, %v123_v20 }
 0x10b   :  { %352 = vmatmul.mubr.msk.f32.vlgmr.msra.gmra.mrb[0].mxu1 %vm144_vm2, %v132_v26  ;;  %229 = vrot.lane.b32.xlu0 %v132_v26, %s421_s3 }
 0x17d   :  { %v230_v27 = vpop.permute.xlu0 %229 }
 0x17e   :  { %363 = vmatmul.mubr.msk.f32.vlgmr.msra.gmra.mrb[2].mxu0 %vm144_vm2, %v230_v27 }
 0x1de   :  { %v214_v29 = vpop.f32.mrb[0].mxu1 }
 0x1df   :  { %v215_v30 = vadd.f32 %v319_v28, %v214_v29  ;;  %v353_v31 = vpop.f32.mrb[1].mxu1 }
 0x1e1   :  { %v303_v32 = vadd.f32 1.0, %v215_v30 }
 0x1e3   :  { %305 = vst.msk [vmem:[%s522_s7] sm:$0x3] %vm304_vm3, %v303_v32 }
 0x251   :  { %v299_v34 = vpop.f32.mrb[2].mxu0 }
 0x252   :  { %v300_v35 = vadd.f32 %v321_v33, %v299_v34  ;;  %v364_v36 = vpop.f32.mrb[3].mxu0 }
 0x254   :  { %306 = vst.msk [vmem:[%s523_s8] sm:$0x3] %vm304_vm3, %v300_v35 }
 0x255   :  { %315 = vsyncpa [#allocation3], 1 }

</bundles_post_ra>
